<compile_context>
chip_gen: v5e
topology: v5e:2x2
jax: 0.10.0
libtpu: 0.0.40
codegen_flags: <defaults>
</compile_context>

<pallas_src>
import functools

import jax
import jax.numpy as jnp
from jax.experimental import pallas as pl
from jax.experimental.pallas import tpu as pltpu

_LANE = 128


def _round_up(x, m):
    return (x + m - 1) // m * m


def _pick_tiling(b, d, s, k):
    """Pick (tile_s, chunk, b_blk) for the [B, D, S] channel-major layout.

    chunk  : lanes per inner compute step, sized so the ~4 live [K, chunk] f32
             temporaries stay around <= ~0.5 MiB (no vreg/VMEM spills).
    tile_s : lanes per DMA block (a multiple of chunk), large enough to
             amortize the ~0.35us fixed per-grid-step overhead.
    b_blk  : batch rows per block, tops per-step input volume up to ~1 MiB
             when the spatial extent alone is too small.
    """
    chunk = ((512 * 1024) // (16 * k)) // _LANE * _LANE
    chunk = max(_LANE, min(2048, chunk))
    if s <= chunk:
        chunk = s
        tile_s = s
    else:
        tile_s = chunk * max(1, min(16, s // chunk))
    ns = -(-s // tile_s)

    per_row_bytes = 4 * d * tile_s
    b_blk = max(1, min(b, 8, (1 << 20) // per_row_bytes))
    # Keep >= 2 grid steps when possible so both v7x TensorCores get work
    # (dimension_semantics is a no-op on single-core v5e/v6e anyway).
    if ns == 1 and b_blk >= b and b >= 2:
        b_blk = (b + 1) // 2
    return tile_s, chunk, b_blk


def _vq_kernel(x_ref, e_ref, q_ref, idx_ref, part_ref, *,
               total_b, total_s, chunk, use_mxu):
    """One grid step: quantize a [B_BLK, D, TILE_S] channel-major block.

    Outputs per step:
      q_ref    [B_BLK, D, TILE_S]  quantized values (straight-through forward)
      idx_ref  [B_BLK, 1, TILE_S]  int32 code indices
      part_ref [1, KP]             lane-dense merged partials:
                                   lanes [0, K) = code counts,
                                   lane K       = sum of squared error.
    """
    e = e_ref[...]                                   # [K, D] resident codebook
    k, d = e.shape
    b_blk, _, tile_s = x_ref.shape
    kp = part_ref.shape[-1]
    num_chunks = tile_s // chunk                     # exact by construction

    bi0 = pl.program_id(0)
    si = pl.program_id(1)

    # Loop-invariant values hoisted once (JAX does not CSE broadcast_in_dim).
    iota_k = jax.lax.broadcasted_iota(jnp.int32, (k, chunk), 0)
    lane = jax.lax.broadcasted_iota(jnp.int32, (1, chunk), 1)
    ones_row = jnp.ones((1, chunk), jnp.float32)
    if use_mxu:
        e_sq = jnp.sum(e * e, axis=1, keepdims=True)             # [K, 1]
        e_cols = None
    else:
        e_sq = None
        e_cols = [e[:, dd:dd + 1] for dd in range(d)]            # D x [K, 1]

    loss_acc = jnp.zeros((1, 1), jnp.float32)
    cnt_acc = jnp.zeros((1, k), jnp.float32)

    # Static inner loops over batch rows / lane chunks: the DMA block can be
    # large (amortizes per-grid-step overhead) while the fused [K, chunk]
    # temporaries (dist / onehot / compares) stay small.  All slice offsets
    # are static Python ints (zero-cost views).
    for bb in range(b_blk):
        row_ok = (bi0 * b_blk + bb) < total_b        # padded batch row mask
        for ci in range(num_chunks):
            off = ci * chunk
            x = x_ref[bb, :, off:off + chunk]        # [D, chunk]

            if use_mxu:
                # Production sizes (large D and/or K): ||e||^2 + ||x||^2 - 2 e.x
                # on the MXU; the argmin stays on the VPU.
                cross = jax.lax.dot_general(
                    e, x, (((1,), (0,)), ((), ())),
                    preferred_element_type=jnp.float32)           # [K, chunk]
                x_sq = jnp.sum(x * x, axis=0, keepdims=True)      # [1, chunk]
                dist = e_sq + x_sq - 2.0 * cross
            else:
                # Tiny-D path (e.g. D=4, K=16): direct (x - e)^2 on the VPU;
                # no cancellation and the MXU would be >95% idle anyway.
                dist = jnp.zeros((k, chunk), jnp.float32)
                for dd in range(d):
                    diff = x[dd:dd + 1, :] - e_cols[dd]           # [K, chunk]
                    dist = dist + diff * diff

            # argmin over K, first occurrence wins (torch.argmin semantics).
            min_d = jnp.min(dist, axis=0, keepdims=True)          # [1, chunk]
            idx = jnp.min(jnp.where(dist == min_d, iota_k, k),
                          axis=0, keepdims=True)                  # [1, chunk]
            onehot = (iota_k == idx).astype(jnp.float32)          # [K, chunk]

            # quantized[d, s] = e[idx[s], d] via a small K-contraction (MXU).
            q = jax.lax.dot_general(e, onehot, (((0,), (0,)), ((), ())),
                                    preferred_element_type=jnp.float32)
            q_ref[bb, :, off:off + chunk] = q
            idx_ref[bb, :, off:off + chunk] = idx

            # Validity mask: the last spatial tile / last batch block may be
            # padded with garbage (possibly NaN).  Pallas discards the
            # out-of-bounds parts of the q/idx edge blocks; the partial sums
            # below are masked explicitly.  (NaN lanes resolve to idx == K and
            # onehot == 0; idx is never used to index in-kernel.)
            valid = jnp.logical_and(
                (si * tile_s + off + lane) < total_s, row_ok)     # [1, chunk]

            if use_mxu:
                # min_d from the MXU formulation is cancellation-prone; the
                # exact (q - x)^2 is only D*chunk extra VPU work here.
                dq = jnp.where(valid, q - x, 0.0)
                loss_c = jnp.sum(jnp.sum(dq * dq, axis=1, keepdims=True),
                                 axis=0, keepdims=True)           # [1, 1]
            else:
                # Reuse min_d: per lane, sum_d (x - e_sel)^2 == min_d, so the
                # (q - x)^2 recomputation of the previous version is gone.
                loss_c = jnp.sum(jnp.where(valid, min_d, 0.0),
                                 axis=1, keepdims=True)           # [1, 1]
            loss_acc = loss_acc + loss_c

            # Lane-major code counts via a tiny ones . onehot^T contraction.
            cnt_acc = cnt_acc + jax.lax.dot_general(
                ones_row, jnp.where(valid, onehot, 0.0),
                (((1,), (1,)), ((), ())),
                preferred_element_type=jnp.float32)               # [1, K]

    # Single merged, lane-dense partials row per grid step (replaces the two
    # last-dim-1 partial outputs / vst.msk stores of the previous version).
    part_ref[...] = jnp.zeros((1, kp), jnp.float32)
    part_ref[:, :k] = cnt_acc
    part_ref[:, k:k + 1] = loss_acc


def vector_quantizer_ema_forward(x_nchw, embedding_weight,
                                 commitment_factor=0.25):
    """x_nchw: [B, C, H, W] f32, embedding_weight: [K, D] f32 with D == C.

    Returns (quantized_nchw, loss, vq_entropy, encodings), matching the
    PyTorch module's forward (eval-mode == train-mode forward values).
    """
    b, c, h, w = x_nchw.shape
    k, d = embedding_weight.shape
    assert d == c, "embedding_dim must equal channel dim"
    s = h * w
    n = b * s

    # Channel-major flatten: NCHW -> [B, D, S] is a free reshape (no HBM
    # transpose round-trip, unlike the NHWC flatten the torch module does).
    x_flat = x_nchw.reshape(b, d, s).astype(jnp.float32)
    e = embedding_weight.astype(jnp.float32)

    tile_s, chunk, b_blk = _pick_tiling(b, d, s, k)
    nb = pl.cdiv(b, b_blk)
    ns = pl.cdiv(s, tile_s)
    kp = _round_up(k + 1, _LANE)            # lane-dense merged partials width
    use_mxu = (d >= 32) or (k >= 128)       # MXU distances at production sizes

    kernel = functools.partial(_vq_kernel, total_b=b, total_s=s,
                               chunk=chunk, use_mxu=use_mxu)

    # Explicit VMEM budget: double-buffered x/q/idx/partial blocks plus compute
    # temporaries, with 2x headroom; capped well under v7x's 64 MiB physical.
    blk_bytes = (2 * b_blk * d * tile_s + b_blk * tile_s) * 4 + kp * 4
    temp_bytes = (6 * k * chunk + 2 * k * d) * 4
    vmem_limit = int(min(48 << 20, max(16 << 20, 2 * (2 * blk_bytes + temp_bytes))))

    cost = pl.CostEstimate(
        flops=int(5 * n * k * d + 4 * n * k),
        transcendentals=0,
        bytes_accessed=int(4 * (2 * n * d + n + k * d + nb * ns * kp)),
    )

    q_flat, idx, part = pl.pallas_call(
        kernel,
        out_shape=(
            jax.ShapeDtypeStruct((b, d, s), jnp.float32),        # quantized
            jax.ShapeDtypeStruct((b, 1, s), jnp.int32),          # code indices
            jax.ShapeDtypeStruct((nb, ns, 1, kp), jnp.float32),  # merged partials
        ),
        grid=(nb, ns),
        in_specs=[
            pl.BlockSpec((b_blk, d, tile_s), lambda bi, si: (bi, 0, si)),
            pl.BlockSpec((k, d), lambda bi, si: (0, 0)),         # resident codebook
        ],
        out_specs=(
            pl.BlockSpec((b_blk, d, tile_s), lambda bi, si: (bi, 0, si)),
            pl.BlockSpec((b_blk, 1, tile_s), lambda bi, si: (bi, 0, si)),
            pl.BlockSpec((None, None, 1, kp), lambda bi, si: (bi, si, 0, 0)),
        ),
        compiler_params=pltpu.CompilerParams(
            dimension_semantics=("parallel", "parallel"),
            vmem_limit_bytes=vmem_limit),
        cost_estimate=cost,
    )(x_flat, e)

    # Reduce the per-step partials into the module's scalar outputs.
    counts = jnp.sum(part[..., :k], axis=(0, 1, 2))              # [K]
    loss = commitment_factor * jnp.sum(part[..., k]) / jnp.float32(n * d)
    avg_probs = counts / jnp.float32(n)
    vq_entropy = -jnp.sum(avg_probs * jnp.log(avg_probs + 1e-10))

    # The module returns f32 one-hot encodings; its row order is the NHWC
    # flatten (b, h, w), which matches the (b, s) order of `idx` here.
    encodings = jax.nn.one_hot(idx.reshape(-1), k, dtype=jnp.float32)

    # Straight-through forward value == quantized; [B, D, S] is NCHW-native.
    q_nchw = q_flat.reshape(b, c, h, w)
    return q_nchw, loss, vq_entropy, encodings


def _reference(x_nchw, e, commitment_factor):
    """Pure-JAX forward mirroring the PyTorch module semantics."""
    b, c, h, w = x_nchw.shape
    k, d = e.shape
    flat = jnp.transpose(x_nchw, (0, 2, 3, 1)).reshape(-1, d)
    dist = jnp.sum((flat[:, None, :] - e[None, :, :]) ** 2, axis=-1)  # [N, K]
    idx = jnp.argmin(dist, axis=1)
    enc = jax.nn.one_hot(idx, k, dtype=jnp.float32)
    q = jnp.take(e, idx, axis=0)                                      # [N, D]
    loss = commitment_factor * jnp.mean((q - flat) ** 2)
    avg = jnp.mean(enc, axis=0)
    ent = -jnp.sum(avg * jnp.log(avg + 1e-10))
    q_nchw = jnp.transpose(q.reshape(b, h, w, d), (0, 3, 1, 2))
    return q_nchw, loss, ent, enc


if __name__ == "__main__":
    key = jax.random.PRNGKey(0)
    k_x, k_e, k_e2, k_i2, k_n2 = jax.random.split(key, 5)

    # ----- Config 1: toy module defaults (exercises the VPU distance path) --
    embedding_dim = 4        # == input channels
    num_embeddings = 16
    commitment_factor = 0.25

    embedding_weight = jax.random.normal(
        k_e, (num_embeddings, embedding_dim), dtype=jnp.float32)
    x = jax.random.normal(k_x, (2, embedding_dim, 16, 16), dtype=jnp.float32)

    quantized, loss, vq_entropy, encodings = jax.block_until_ready(
        vector_quantizer_ema_forward(x, embedding_weight, commitment_factor))

    assert quantized.shape == (2, embedding_dim, 16, 16)
    assert encodings.shape == (2 * 16 * 16, num_embeddings)
    assert loss.shape == () and vq_entropy.shape == ()

    r_q, r_loss, r_ent, r_enc = _reference(x, embedding_weight,
                                           commitment_factor)
    assert jnp.allclose(quantized, r_q, atol=1e-6)
    assert jnp.allclose(loss, r_loss, atol=1e-6, rtol=1e-5)
    assert jnp.allclose(vq_entropy, r_ent, atol=1e-5, rtol=1e-5)
    assert jnp.array_equal(encodings, r_enc)

    # ----- Config 2: production-ish D/K (exercises the MXU distance path) ---
    d2, k2 = 32, 256
    e2 = jax.random.normal(k_e2, (k2, d2), dtype=jnp.float32)
    assign = jax.random.randint(k_i2, (2 * 8 * 8,), 0, k2)
    # Inputs near codebook entries so the nearest code is unambiguous.
    rows2 = e2[assign] + 0.01 * jax.random.normal(
        k_n2, (2 * 8 * 8, d2), dtype=jnp.float32)
    x2 = jnp.transpose(rows2.reshape(2, 8, 8, d2), (0, 3, 1, 2))      # NCHW

    q2, loss2, ent2, enc2 = jax.block_until_ready(
        vector_quantizer_ema_forward(x2, e2, commitment_factor))
    r_q2, r_loss2, r_ent2, r_enc2 = _reference(x2, e2, commitment_factor)
    assert jnp.allclose(q2, r_q2, atol=1e-6)
    assert jnp.allclose(loss2, r_loss2, rtol=1e-4, atol=1e-8)
    assert jnp.allclose(ent2, r_ent2, atol=1e-5, rtol=1e-5)
    assert jnp.array_equal(enc2, r_enc2)

    print("KERNEL_OK")
</pallas_src>

<mosaic_0001>
module attributes {stable_mosaic.version = 11 : i64} {
  func.func @_vq_kernel(%arg0: i32, %arg1: i32, %arg2: memref<1x4x256xf32, #tpu.memory_space<vmem>>, %arg3: memref<16x4xf32, #tpu.memory_space<vmem>>, %arg4: memref<1x4x256xf32, #tpu.memory_space<vmem>>, %arg5: memref<1x1x256xi32, #tpu.memory_space<vmem>>, %arg6: memref<1x1x1x128xf32, #tpu.memory_space<vmem>>) attributes {dimension_semantics = [#tpu.dimension_semantics<parallel>, #tpu.dimension_semantics<parallel>], iteration_bounds = array<i64: 2, 1>, scalar_prefetch = 0 : i64, scratch_operands = 0 : i64, tpu.core_type = #tpu.core_type<tc>, window_params = [{transform_indices = @transform_0, window_bounds = array<i64: 1, 4, 256>}, {pipeline_mode = #tpu.pipeline_mode<synchronous>, transform_indices = @transform_1, window_bounds = array<i64: 16, 4>}, {transform_indices = @transform_2, window_bounds = array<i64: 1, 4, 256>}, {transform_indices = @transform_3, window_bounds = array<i64: 1, 1, 256>}, {transform_indices = @transform_4, window_bounds = array<i64: 1, 1, 1, 128>}]} {
    %c0 = arith.constant 0 : index
    %c0_0 = arith.constant 0 : index
    %0 = vector.load %arg3[%c0, %c0_0] : memref<16x4xf32, #tpu.memory_space<vmem>>, vector<16x4xf32>
    %1 = tpu.iota {dimensions = array<i32: 0>} : vector<16x256xi32>
    %2 = tpu.iota {dimensions = array<i32: 1>} : vector<1x256xi32>
    %cst = arith.constant 1.000000e+00 : f32
    %3 = vector.broadcast %cst : f32 to vector<1x256xf32>
    %4 = vector.extract_strided_slice %0 {offsets = [0, 0], sizes = [16, 1], strides = [1, 1]} : vector<16x4xf32> to vector<16x1xf32>
    %5 = vector.extract_strided_slice %0 {offsets = [0, 1], sizes = [16, 1], strides = [1, 1]} : vector<16x4xf32> to vector<16x1xf32>
    %6 = vector.extract_strided_slice %0 {offsets = [0, 2], sizes = [16, 1], strides = [1, 1]} : vector<16x4xf32> to vector<16x1xf32>
    %7 = vector.extract_strided_slice %0 {offsets = [0, 3], sizes = [16, 1], strides = [1, 1]} : vector<16x4xf32> to vector<16x1xf32>
    %cst_1 = arith.constant 0.000000e+00 : f32
    %8 = vector.broadcast %cst_1 : f32 to vector<1x1xf32>
    %cst_2 = arith.constant 0.000000e+00 : f32
    %9 = vector.broadcast %cst_2 : f32 to vector<1x16xf32>
    %c1_i32 = arith.constant 1 : i32
    %10 = arith.muli %arg0, %c1_i32 : i32
    %c0_i32 = arith.constant 0 : i32
    %11 = arith.addi %10, %c0_i32 : i32
    %c2_i32 = arith.constant 2 : i32
    %12 = arith.cmpi slt, %11, %c2_i32 : i32
    %c0_3 = arith.constant 0 : index
    %c0_4 = arith.constant 0 : index
    %c0_5 = arith.constant 0 : index
    %13 = vector.load %arg2[%c0_3, %c0_4, %c0_5] : memref<1x4x256xf32, #tpu.memory_space<vmem>>, vector<1x4x256xf32>
    %14 = vector.shape_cast %13 : vector<1x4x256xf32> to vector<4x256xf32>
    %cst_6 = arith.constant 0.000000e+00 : f32
    %15 = vector.broadcast %cst_6 : f32 to vector<16x256xf32>
    %16 = vector.extract_strided_slice %14 {offsets = [0, 0], sizes = [1, 256], strides = [1, 1]} : vector<4x256xf32> to vector<1x256xf32>
    %17 = vector.broadcast %16 : vector<1x256xf32> to vector<16x256xf32>
    %18 = vector.broadcast %4 : vector<16x1xf32> to vector<16x256xf32>
    %19 = arith.subf %17, %18 : vector<16x256xf32>
    %20 = arith.mulf %19, %19 : vector<16x256xf32>
    %21 = arith.addf %15, %20 : vector<16x256xf32>
    %22 = vector.extract_strided_slice %14 {offsets = [1, 0], sizes = [1, 256], strides = [1, 1]} : vector<4x256xf32> to vector<1x256xf32>
    %23 = vector.broadcast %22 : vector<1x256xf32> to vector<16x256xf32>
    %24 = vector.broadcast %5 : vector<16x1xf32> to vector<16x256xf32>
    %25 = arith.subf %23, %24 : vector<16x256xf32>
    %26 = arith.mulf %25, %25 : vector<16x256xf32>
    %27 = arith.addf %21, %26 : vector<16x256xf32>
    %28 = vector.extract_strided_slice %14 {offsets = [2, 0], sizes = [1, 256], strides = [1, 1]} : vector<4x256xf32> to vector<1x256xf32>
    %29 = vector.broadcast %28 : vector<1x256xf32> to vector<16x256xf32>
    %30 = vector.broadcast %6 : vector<16x1xf32> to vector<16x256xf32>
    %31 = arith.subf %29, %30 : vector<16x256xf32>
    %32 = arith.mulf %31, %31 : vector<16x256xf32>
    %33 = arith.addf %27, %32 : vector<16x256xf32>
    %34 = vector.extract_strided_slice %14 {offsets = [3, 0], sizes = [1, 256], strides = [1, 1]} : vector<4x256xf32> to vector<1x256xf32>
    %35 = vector.broadcast %34 : vector<1x256xf32> to vector<16x256xf32>
    %36 = vector.broadcast %7 : vector<16x1xf32> to vector<16x256xf32>
    %37 = arith.subf %35, %36 : vector<16x256xf32>
    %38 = arith.mulf %37, %37 : vector<16x256xf32>
    %39 = arith.addf %33, %38 : vector<16x256xf32>
    %cst_7 = arith.constant dense<0x7F800000> : vector<256xf32>
    %40 = vector.multi_reduction <minimumf>, %39, %cst_7 [0] : vector<16x256xf32> to vector<256xf32>
    %41 = vector.shape_cast %40 : vector<256xf32> to vector<1x256xf32>
    %42 = vector.broadcast %41 : vector<1x256xf32> to vector<16x256xf32>
    %43 = arith.cmpf oeq, %39, %42 : vector<16x256xf32>
    %c16_i32 = arith.constant 16 : i32
    %44 = vector.broadcast %c16_i32 : i32 to vector<16x256xi32>
    %45 = arith.select %43, %1, %44 : vector<16x256xi1>, vector<16x256xi32>
    %cst_8 = arith.constant dense<2147483647> : vector<256xi32>
    %46 = vector.multi_reduction <minsi>, %45, %cst_8 [0] : vector<16x256xi32> to vector<256xi32>
    %47 = vector.shape_cast %46 : vector<256xi32> to vector<1x256xi32>
    %48 = vector.broadcast %47 : vector<1x256xi32> to vector<16x256xi32>
    %49 = arith.cmpi eq, %1, %48 : vector<16x256xi32>
    %50 = arith.extui %49 : vector<16x256xi1> to vector<16x256xi32>
    %51 = arith.sitofp %50 : vector<16x256xi32> to vector<16x256xf32>
    %cst_9 = arith.constant dense<0.000000e+00> : vector<4x256xf32>
    %52 = tpu.matmul %0, %51, %cst_9 {dimension_numbers = #tpu.dot_dimension_numbers<[0], [0], [1], [1], [0, 1, 1, 1], [], []>} : vector<16x4xf32>, vector<16x256xf32>, vector<4x256xf32> -> vector<4x256xf32>
    %c0_10 = arith.constant 0 : index
    %c0_11 = arith.constant 0 : index
    %c0_12 = arith.constant 0 : index
    %53 = vector.load %arg4[%c0_10, %c0_11, %c0_12] : memref<1x4x256xf32, #tpu.memory_space<vmem>>, vector<1x4x256xf32>
    %54 = vector.shape_cast %53 : vector<1x4x256xf32> to vector<4x256xf32>
    %55 = vector.shape_cast %52 : vector<4x256xf32> to vector<1x4x256xf32>
    tpu.vector_store %arg4[%c0_10, %c0_11, %c0_12], %55 {strides = array<i32>} : memref<1x4x256xf32, #tpu.memory_space<vmem>>, vector<1x4x256xf32>,
    %c0_13 = arith.constant 0 : index
    %c0_14 = arith.constant 0 : index
    %c0_15 = arith.constant 0 : index
    %56 = vector.load %arg5[%c0_13, %c0_14, %c0_15] : memref<1x1x256xi32, #tpu.memory_space<vmem>>, vector<1x1x256xi32>
    %57 = vector.shape_cast %56 : vector<1x1x256xi32> to vector<1x256xi32>
    %58 = vector.shape_cast %47 : vector<1x256xi32> to vector<1x1x256xi32>
    tpu.vector_store %arg5[%c0_13, %c0_14, %c0_15], %58 {strides = array<i32>} : memref<1x1x256xi32, #tpu.memory_space<vmem>>, vector<1x1x256xi32>,
    %c256_i32 = arith.constant 256 : i32
    %59 = arith.muli %arg1, %c256_i32 : i32
    %c0_i32_16 = arith.constant 0 : i32
    %60 = arith.addi %59, %c0_i32_16 : i32
    %61 = vector.broadcast %60 : i32 to vector<1x256xi32>
    %62 = arith.addi %61, %2 : vector<1x256xi32>
    %c256_i32_17 = arith.constant 256 : i32
    %63 = vector.broadcast %c256_i32_17 : i32 to vector<1x256xi32>
    %64 = arith.cmpi slt, %62, %63 : vector<1x256xi32>
    %65 = vector.broadcast %12 : i1 to vector<1x256xi1>
    %66 = arith.andi %64, %65 : vector<1x256xi1>
    %cst_18 = arith.constant 0.000000e+00 : f32
    %67 = vector.broadcast %cst_18 : f32 to vector<1x256xf32>
    %68 = arith.select %66, %41, %67 : vector<1x256xi1>, vector<1x256xf32>
    %cst_19 = arith.constant dense<0.000000e+00> : vector<1xf32>
    %69 = vector.multi_reduction <add>, %68, %cst_19 [1] : vector<1x256xf32> to vector<1xf32>
    %70 = vector.shape_cast %69 : vector<1xf32> to vector<1x1xf32>
    %71 = arith.addf %8, %70 : vector<1x1xf32>
    %cst_20 = arith.constant 0.000000e+00 : f32
    %72 = vector.shape_cast %66 : vector<1x256xi1> to vector<1x256xi1>
    %73 = vector.broadcast %72 : vector<1x256xi1> to vector<16x256xi1>
    %74 = vector.broadcast %cst_20 : f32 to vector<16x256xf32>
    %75 = arith.select %73, %51, %74 : vector<16x256xi1>, vector<16x256xf32>
    %cst_21 = arith.constant dense<0.000000e+00> : vector<1x16xf32>
    %76 = tpu.matmul %3, %75, %cst_21 {dimension_numbers = #tpu.dot_dimension_numbers<[1], [1], [0], [0], [0, 0, 1, 0], [], []>} : vector<1x256xf32>, vector<16x256xf32>, vector<1x16xf32> -> vector<1x16xf32>
    %77 = arith.addf %9, %76 : vector<1x16xf32>
    %cst_22 = arith.constant 0.000000e+00 : f32
    %78 = vector.broadcast %cst_22 : f32 to vector<1x128xf32>
    %c0_23 = arith.constant 0 : index
    %c0_24 = arith.constant 0 : index
    %c0_25 = arith.constant 0 : index
    %c0_26 = arith.constant 0 : index
    %79 = vector.load %arg6[%c0_23, %c0_24, %c0_25, %c0_26] : memref<1x1x1x128xf32, #tpu.memory_space<vmem>>, vector<1x1x1x128xf32>
    %80 = vector.shape_cast %79 : vector<1x1x1x128xf32> to vector<1x128xf32>
    %81 = vector.shape_cast %78 : vector<1x128xf32> to vector<1x1x1x128xf32>
    tpu.vector_store %arg6[%c0_23, %c0_24, %c0_25, %c0_26], %81 {strides = array<i32>} : memref<1x1x1x128xf32, #tpu.memory_space<vmem>>, vector<1x1x1x128xf32>,
    %c0_27 = arith.constant 0 : index
    %c0_28 = arith.constant 0 : index
    %c0_29 = arith.constant 0 : index
    %c0_30 = arith.constant 0 : index
    %82 = vector.load %arg6[%c0_27, %c0_28, %c0_29, %c0_30] : memref<1x1x1x128xf32, #tpu.memory_space<vmem>>, vector<1x1x1x16xf32>
    %83 = vector.shape_cast %82 : vector<1x1x1x16xf32> to vector<1x16xf32>
    %84 = vector.shape_cast %77 : vector<1x16xf32> to vector<1x1x1x16xf32>
    tpu.vector_store %arg6[%c0_27, %c0_28, %c0_29, %c0_30], %84 {strides = array<i32>} : memref<1x1x1x128xf32, #tpu.memory_space<vmem>>, vector<1x1x1x16xf32>,
    %c0_31 = arith.constant 0 : index
    %c0_32 = arith.constant 0 : index
    %c0_33 = arith.constant 0 : index
    %c16 = arith.constant 16 : index
    %85 = vector.load %arg6[%c0_31, %c0_32, %c0_33, %c16] : memref<1x1x1x128xf32, #tpu.memory_space<vmem>>, vector<1x1x1x1xf32>
    %86 = vector.shape_cast %85 : vector<1x1x1x1xf32> to vector<1x1xf32>
    %87 = vector.shape_cast %71 : vector<1x1xf32> to vector<1x1x1x1xf32>
    tpu.vector_store %arg6[%c0_31, %c0_32, %c0_33, %c16], %87 {strides = array<i32>} : memref<1x1x1x128xf32, #tpu.memory_space<vmem>>, vector<1x1x1x1xf32>,
    return
  }
  func.func @transform_0(%arg0: i32, %arg1: i32) -> (i32, i32, i32) {
    %c0_i32 = arith.constant 0 : i32
    %c0_i32_0 = arith.constant 0 : i32
    return %arg0, %c0_i32, %arg1 : i32, i32, i32
  }
  func.func @transform_1(%arg0: i32, %arg1: i32) -> (i32, i32) {
    %c0_i32 = arith.constant 0 : i32
    %c0_i32_0 = arith.constant 0 : i32
    %c0_i32_1 = arith.constant 0 : i32
    return %c0_i32, %c0_i32_0 : i32, i32
  }
  func.func @transform_2(%arg0: i32, %arg1: i32) -> (i32, i32, i32) {
    %c0_i32 = arith.constant 0 : i32
    %c0_i32_0 = arith.constant 0 : i32
    return %arg0, %c0_i32, %arg1 : i32, i32, i32
  }
  func.func @transform_3(%arg0: i32, %arg1: i32) -> (i32, i32, i32) {
    %c0_i32 = arith.constant 0 : i32
    %c0_i32_0 = arith.constant 0 : i32
    return %arg0, %c0_i32, %arg1 : i32, i32, i32
  }
  func.func @transform_4(%arg0: i32, %arg1: i32) -> (i32, i32, i32, i32) {
    %c0_i32 = arith.constant 0 : i32
    %c0_i32_0 = arith.constant 0 : i32
    %c0_i32_1 = arith.constant 0 : i32
    return %arg0, %arg1, %c0_i32, %c0_i32_0 : i32, i32, i32, i32
  }
}

</mosaic_0001>

<bundles_post_ra>
// kernel: tpu_custom_call.1
= control target key start
LH: loop header
LB: loop body
LE: loop exit
PB: predicated region body
PF: predicated region fallthrough
CT: control target
= control target key end

     0   :  { %s1239_s0 = inlined_call_operand.vmem [shape: f32[2,4,256], index: 0, kind: input, shape index: {}]   ;;  %s1240_s1 = inlined_call_operand.vmem [shape: f32[16,4], index: 1, kind: input, shape index: {}]   ;;  %s1241_s2 = inlined_call_operand.hbm [shape: f32[2,4,256], index: 2, kind: output, shape index: {0}]   ;;  %s1242_s3 = inlined_call_operand.hbm [shape: s32[2,1,256], index: 3, kind: output, shape index: {1}]   ;;  %s1243_s4 = inlined_call_operand.hbm [shape: f32[2,1,1,128], index: 4, kind: output, shape index: {2}]  }
   0x1   :  { %1245 = sst [smem:[#allocation9_spill]] %s1239_s0 }
   0x2   :  { %1246 = sst [smem:[#allocation10_spill]] %s1240_s1 }
   0x3   :  { %10 = vsyncpa [#allocation3], 0 }
   0x4   :  { %12 = vsyncpa [#allocation3 + $0x1], 0 }
   0x5   :  { %13 = vsyncpa [#allocation5], 0 }
   0x6   :  { %15 = vsyncpa [#allocation5 + $0x1], 0  ;;  %s1057_s15 = smov 0   ;;  %s1059_s16 = smov 0  }
   0x7   :  { %s1061_s17 = smov 0   ;;  %s1063_s18 = smov 0  }
   0x8   :  { %s1065_s19 = smov 0   ;;  %s1067_s20 = smov 0  }
   0x9 LB: > { %s778_s21 = sadd.s32 4294967295, %s1024_s20   ;;  %s1244_s22 = sadd.s32 4294967294, %s1024_s20   ;;  %s1024_s20 = sphi %s1067_s20, %s21_s20   ;;  %s1020_s19 = sphi %s1065_s19, %s1258_s19   ;;  %s1016_s18 = sphi %s1063_s18, %s1257_s18   ;;  %s1012_s17 = sphi %s1061_s17, %s1256_s17   ;;  %s1008_s16 = sphi %s1059_s16, %s1255_s16   ;;  %s1004_s15 = sphi %s1057_s15, %s1254_s15  }
   0xa   : > { %s33_s23 = sadd.s32 1, %s1020_s19  ;;  %s91_s24 = sadd.s32 1, %s1012_s17 }
   0xb   : > { %p35_p0 = scmp.ge.s32.totalorder %s33_s23, 2  ;;  %p101_p1 = scmp.ne.s32.totalorder %s1012_s17, %s1008_s16 }
   0xc   : > { %p102_p2 = scmp.eq.s32.totalorder %s778_s21, 1  ;;  %p107_p3 = scmp.ne.s32.totalorder %s1008_s16, %s1004_s15 }
   0xd   : > { %s1260_s23 = smov (%p35_p0, %s33_s23), 0  ;;  %p108_p5 = scmp.eq.s32.totalorder %s1244_s22, 1 }
   0xe   : > { %p1099_p4 = por %p102_p2, %p101_p1  ;;  %s86_s26 = ssub.s32 %s1020_s19, %s1260_s23 }
   0xf   : > { %p782_p6 = scmp.ge.s32.totalorder %s1024_s20, 1  ;;  %p89_p7 = scmp.eq.s32.totalorder %s86_s26, 0 }
  0x10   : > { %p1108_p8 = por %p108_p5, %p107_p3  ;;  %p198_p9 = scmp.lt.s32.totalorder %s1024_s20, 3 }
  0x11   : > { %s1114_s28 = scalar_select %p89_p7, %s1012_s17, %s91_s24  }
  0x12   : > { %p199_p10 = pnand %p782_p6, %p198_p9 }
  0x13   : > { %s1249_s1 = sld [smem:[#allocation10_spill]] (!%p199_p10)  ;;  %p238_p11 = scmp.lt.s32.totalorder (!%p199_p10), %s1016_s18, 1 }
  0x14   : > { %202 = sbr.rel (%p199_p10) target bundleno = 359 (0x167), region = 28  ;;  %s1250_s0 = sld [smem:[#allocation9_spill]] (!%p199_p10) }
  0x15   : > { %p257_p12 = scmp.lt.s32.totalorder (!%p199_p10), %s1016_s18, 2  ;;  %s1142_s13 = sand.u32 (!%p199_p10), 1, %s1008_s16  }
  0x16   : > { %s784_s14 = sshll.u32 (!%p199_p10), %s1142_s13, 1  ;;  %s1156_s26 = scalar_lea.vmem (!%p199_p10), [#allocation6], %s1142_s13 }
  0x17   : > { %s230_s24 = scalar_lea.vmem (!%p199_p10), [#allocation4], %s784_s14  ;;  %s1161_s29 = sand.u32 (!%p199_p10), 1, %s778_s21  }
  0x18   : > { %s805_s30 = sshll.u32 (!%p199_p10), %s1016_s18, 1  ;;  %s589_s10 = scalar_lea.sflag (!%p199_p10), [#allocation5], %s1161_s29 }
  0x19   : > { %v249_v0 = vld [vmem:[%s1249_s1] sm:$0xff]  ;;  %v1026_v1 = vmov 2   ;;  %v1027_v2 = vmov 1   ;;  %v1028_v3 = vmov 0   ;;  %v250_v4 = vld [vmem:[%s1249_s1 + $0x8] sm:$0xff]  ;;  %v1029_v5 = vmov 3  }
  0x1a   : > { %883 = vset.pattern.permute.xlu2 %v1026_v1  ;;  %882 = vset.pattern.permute.xlu1 %v1027_v2  ;;  %s239_s7 = scalar_select %p238_p11, %s1016_s18, 1  ;;  %vm506_vm13 = vcmask 1040384  }
  0x1b   : > { %881 = vset.pattern.permute.xlu0 %v1028_v3  ;;  %321 = vperm.xlu2 %883, %v249_v0   ;;  %s519_s12 = scalar_select %p257_p12, 1, 0 }
  0x1c   : > { %295 = vperm.xlu1 %882, %v249_v0   ;;  %268 = vperm.xlu0 %881, %v249_v0   ;;  %s808_s8 = sshll.u32 %s239_s7, 3  ;;  %s622_s7 = scalar_lea.hbm %s1242_s3, %s805_s30 }
  0x1d   : > { %s245_s11 = scalar_lea.vmem %s1250_s0, %s808_s8  ;;  %s624_s8 = sshll.u32 %s230_s24, 4  ;;  %s625_s8 = int_to_ptr.vmem [resolvable:$true] %s624_s8 }
  0x1e   : > { %v258_v6 = vld [vmem:[%s245_s11] sm:$0xff]  ;;  %s626_s9 = sshll.u32 %s622_s7, 4  ;;  %s906_s22 = scalar_lea.hbm %s1242_s3, 4  ;;  %s627_s9 = int_to_ptr.hbm [resolvable:$true] %s626_s9 }
  0x1f   : > { %v288_v7 = vperm.slane %v258_v6, 1  ;;  %v289_v8 = vperm.slane %v258_v6, 5  ;;  %v260_v9 = vperm.slane %v258_v6, 0  ;;  %v261_v10 = vperm.slane %v258_v6, 4  ;;  %s900_s11 = sshra.s32 %s627_s9, 4  ;;  %s901_s11 = int_to_ptr.hbm [resolvable:$true] %s900_s11 }
  0x20   : > { %v314_v18 = vperm.slane %v258_v6, 2  ;;  %v315_v19 = vperm.slane %v258_v6, 6  ;;  %v340_v28 = vperm.slane %v258_v6, 3  ;;  %v341_v29 = vperm.slane %v258_v6, 7  ;;  %p907_p2 = scmp.lt.s32.totalorder %s901_s11, %s1242_s3 }
  0x21   : > { %v292_v14 = vperm.slane %v288_v7, 1  ;;  %v293_v15 = vperm.slane %v289_v8, 1  ;;  %v264_v16 = vperm.slane %v260_v9, 0  ;;  %v265_v17 = vperm.slane %v261_v10, 0 }
  0x22   : > { %v318_v24 = vperm.slane %v314_v18, 2  ;;  %v319_v25 = vperm.slane %v315_v19, 2  ;;  %v344_v47 = vperm.slane %v340_v28, 3  ;;  %v345_v48 = vperm.slane %v341_v29, 3 }
  0x23   : > { %325 = vperm.xlu2 %883, %v250_v4  }
  0x24   : > { %299 = vperm.xlu1 %882, %v250_v4   ;;  %273 = vperm.xlu0 %881, %v250_v4  }
  0x2c   : > { %885 = vset.pattern.permute.xlu1 %v1029_v5  ;;  %884 = vset.pattern.permute.xlu0 %v1029_v5 }
  0x2d   : > { %351 = vperm.xlu1 %885, %v250_v4   ;;  %347 = vperm.xlu0 %884, %v249_v0  }
  0x49   : > { %422 = vxpose.xlu2.b32.start [1/2] (short) (narrow) %v249_v0, 8 }
  0x51   : > { %423 = vxpose.xlu2.b32.end [2/2] (short) (narrow) %v250_v4, 8 }
  0x75   : > { %v322_v11 = vpop.permute.xlu2 %321 }
  0x76   : > { %v328_v43 = vsub.f32 %v318_v24, %v322_v11  ;;  %v329_v44 = vsub.f32 %v319_v25, %v322_v11 }
  0x78   : > { %v332_v53 = vmul.f32 %v328_v43, %v328_v43  ;;  %v333_v54 = vmul.f32 %v329_v44, %v329_v44 }
  0x7d   : > { %v326_v34 = vpop.permute.xlu2 %325 }
  0x7e   : > { %v330_v45 = vsub.f32 %v318_v24, %v326_v34  ;;  %v331_v46 = vsub.f32 %v319_v25, %v326_v34  ;;  %v520_v25 = vstv %s519_s12  ;;  %s902_s12 = scalar_lea.hbm %s901_s11, 2 }
  0x7f   : > { %vm1131_vm0 = vcmp.eq.s32.totalorder %v520_v25, 1  ;;  %p903_p13 = scmp.ne.s32.totalorder %s901_s11, %s902_s12  ;;  %p908_p3 = scmp.lt.s32.totalorder %s906_s22, %s902_s12 }
  0x80   : > { %v334_v55 = vmul.f32 %v330_v45, %v330_v45  ;;  %v335_v56 = vmul.f32 %v331_v46, %v331_v46 }
  0x81   : > { %p904_p0 = pnand %p903_p13, %p1099_p4  ;;  %p909_p5 = por %p908_p3, %p907_p2 }
  0x83   : > { %p905_p1 = pneg %p904_p0 }
  0x85   : > { %p910_p6 = pnand %p909_p5, %p905_p1 }
  0x8e   : > { %v296_v12 = vpop.permute.xlu1 %295  ;;  %v269_v13 = vpop.permute.xlu0 %268 }
  0x8f   : > { %v302_v20 = vsub.f32 %v292_v14, %v296_v12  ;;  %v303_v21 = vsub.f32 %v293_v15, %v296_v12  ;;  %v276_v22 = vsub.f32 %v264_v16, %v269_v13  ;;  %v277_v23 = vsub.f32 %v265_v17, %v269_v13 }
  0x91   : > { %v306_v35 = vmul.f32 %v302_v20, %v302_v20  ;;  %v307_v36 = vmul.f32 %v303_v21, %v303_v21  ;;  %v280_v37 = vmul.f32 %v276_v22, %v276_v22  ;;  %v281_v38 = vmul.f32 %v277_v23, %v277_v23 }
  0x93   : > { %v310_v49 = vadd.f32 %v306_v35, %v280_v37  ;;  %v311_v50 = vadd.f32 %v307_v36, %v281_v38 }
  0x95   : > { %v336_v1 = vadd.f32 %v332_v53, %v310_v49  ;;  %v337_v2 = vadd.f32 %v333_v54, %v311_v50  ;;  %v1031_v53 = vmov 0.0  }
  0x96   : > { %v300_v26 = vpop.permute.xlu1 %299  ;;  %v274_v27 = vpop.permute.xlu0 %273  ;;  %578 = vst [vmem:[%s1156_s26] sm:$0x1] %v1031_v53 }
  0x97   : > { %v304_v30 = vsub.f32 %v292_v14, %v300_v26  ;;  %v305_v31 = vsub.f32 %v293_v15, %v300_v26  ;;  %v278_v32 = vsub.f32 %v264_v16, %v274_v27  ;;  %v279_v33 = vsub.f32 %v265_v17, %v274_v27 }
  0x98   : > { %v251_v15 = vlaneseq }
  0x99   : > { %v308_v39 = vmul.f32 %v304_v30, %v304_v30  ;;  %v309_v40 = vmul.f32 %v305_v31, %v305_v31  ;;  %v282_v41 = vmul.f32 %v278_v32, %v278_v32  ;;  %v283_v42 = vmul.f32 %v279_v33, %v279_v33 }
  0x9a   : > { %v1128_v20 = vshrl.u32 %v251_v15, 7 }
  0x9b   : > { %v312_v51 = vadd.f32 %v308_v39, %v282_v41  ;;  %v313_v52 = vadd.f32 %v309_v40, %v283_v42 }
  0x9c   : > { %v253_v26 = vadd.s32 8, %v1128_v20 }
  0x9d   : > { %v338_v63 = vadd.f32 %v334_v55, %v312_v51  ;;  %v339_v0 = vadd.f32 %v335_v56, %v313_v52  ;;  %v1030_v52 = vmov 1.0  }
  0x9f   : > { %v352_v57 = vpop.permute.xlu1 %351  ;;  %v348_v58 = vpop.permute.xlu0 %347 }
  0xa0   : > { %v356_v59 = vsub.f32 %v344_v47, %v352_v57  ;;  %v357_v60 = vsub.f32 %v345_v48, %v352_v57  ;;  %v354_v61 = vsub.f32 %v344_v47, %v348_v58  ;;  %v355_v62 = vsub.f32 %v345_v48, %v348_v58 }
  0xa2   : > { %v360_v3 = vmul.f32 %v356_v59, %v356_v59  ;;  %v361_v4 = vmul.f32 %v357_v60, %v357_v60  ;;  %v358_v5 = vmul.f32 %v354_v61, %v354_v61  ;;  %v359_v6 = vmul.f32 %v355_v62, %v355_v62 }
  0xa4   : > { %v364_v7 = vadd.f32 %v360_v3, %v338_v63  ;;  %v365_v8 = vadd.f32 %v361_v4, %v339_v0  ;;  %v362_v9 = vadd.f32 %v358_v5, %v336_v1  ;;  %v363_v10 = vadd.f32 %v359_v6, %v337_v2 }
  0xa6   : > { %v366_v11 = vmin.f32 %v362_v9, %v364_v7  ;;  %v373_v12 = vmin.f32 %v363_v10, %v365_v8 }
  0xa8   : > { %v367_v13 = vrot.slane %v366_v11, 4  ;;  %v374_v14 = vrot.slane %v373_v12, 4 }
  0xaa   : > { %v368_v16 = vmin.f32 %v366_v11, %v367_v13  ;;  %v375_v17 = vmin.f32 %v373_v12, %v374_v14 }
  0xac   : > { %v369_v18 = vrot.slane %v368_v16, 2  ;;  %v376_v19 = vrot.slane %v375_v17, 2 }
  0xae   : > { %v370_v21 = vmin.f32 %v368_v16, %v369_v18  ;;  %v377_v22 = vmin.f32 %v375_v17, %v376_v19 }
  0xb0   : > { %v371_v23 = vrot.slane %v370_v21, 1  ;;  %v378_v24 = vrot.slane %v377_v22, 1 }
  0xb2   : > { %v372_v27 = vmin.f32 %v370_v21, %v371_v23  ;;  %v379_v28 = vmin.f32 %v377_v22, %v378_v24 }
  0xb4   : > { %vm380_vm1 = vcmp.eq.f32.partialorder %v362_v9, %v372_v27  ;;  %vm381_vm2 = vcmp.eq.f32.partialorder %v363_v10, %v379_v28  ;;  %vm382_vm3 = vcmp.eq.f32.partialorder %v364_v7, %v372_v27  ;;  %vm383_vm4 = vcmp.eq.f32.partialorder %v365_v8, %v379_v28 }
  0xb5   : > { %v384_v30 = vsel %vm380_vm1, %v1128_v20, 16  ;;  %v385_v31 = vsel %vm381_vm2, %v1128_v20, 16  ;;  %v386_v32 = vsel %vm382_vm3, %v253_v26, 16  ;;  %v387_v33 = vsel %vm383_vm4, %v253_v26, 16 }
  0xb6   : > { %vm388_vm5 = vcmp.lt.s32.totalorder %v384_v30, %v386_v32  ;;  %vm399_vm6 = vcmp.lt.s32.totalorder %v385_v31, %v387_v33  ;;  %v524_v34 = vsel %vm1131_vm0, %v372_v27, 0.0  ;;  %v525_v35 = vsel %vm1131_vm0, %v379_v28, 0.0 }
  0xb7   : > { %v389_v36 = vsel %vm388_vm5, %v384_v30, %v386_v32  ;;  %v400_v37 = vsel %vm399_vm6, %v385_v31, %v387_v33  ;;  %v526_v38 = vadd.f32 %v525_v35, %v524_v34  ;;  %vm510_vm1 = vcmp.lt.s32.totalorder %v251_v15, 256 }
  0xb8   : > { %v390_v39 = vrot.slane %v389_v36, 4  ;;  %v401_v40 = vrot.slane %v400_v37, 4  ;;  %vm454_vm4 = vcmask 130048  }
  0xb9   : > { %527 = vadd.xlane.f32.xlu1 %v526_v38 }
  0xba   : > { %vm391_vm7 = vcmp.lt.s32.totalorder %v389_v36, %v390_v39  ;;  %vm402_vm8 = vcmp.lt.s32.totalorder %v400_v37, %v401_v40 }
  0xbb   : > { %v392_v41 = vsel %vm391_vm7, %v389_v36, %v390_v39  ;;  %v403_v42 = vsel %vm402_vm8, %v400_v37, %v401_v40 }
  0xbc   : > { %v393_v43 = vrot.slane %v392_v41, 2  ;;  %v404_v44 = vrot.slane %v403_v42, 2 }
  0xbe   : > { %vm394_vm9 = vcmp.lt.s32.totalorder %v392_v41, %v393_v43  ;;  %vm405_vm10 = vcmp.lt.s32.totalorder %v403_v42, %v404_v44 }
  0xbf   : > { %v395_v45 = vsel %vm394_vm9, %v392_v41, %v393_v43  ;;  %v406_v46 = vsel %vm405_vm10, %v403_v42, %v404_v44 }
  0xc0   : > { %v396_v47 = vrot.slane %v395_v45, 1  ;;  %v407_v48 = vrot.slane %v406_v46, 1 }
  0xc2   : > { %vm397_vm11 = vcmp.lt.s32.totalorder %v395_v45, %v396_v47  ;;  %vm408_vm12 = vcmp.lt.s32.totalorder %v406_v46, %v407_v48 }
  0xc3   : > { %v398_v49 = vsel %vm397_vm11, %v395_v45, %v396_v47  ;;  %v409_v50 = vsel %vm408_vm12, %v406_v46, %v407_v48 }
  0xc4   : > { %vm412_vm14 = vcmp.eq.s32.totalorder %v253_v26, %v398_v49  ;;  %vm413_vm15 = vcmp.eq.s32.totalorder %v253_v26, %v409_v50  ;;  %v505_v51 = vrot.slane %v409_v50, 7  ;;  %vm410_vm2 = vcmp.eq.s32.totalorder %v1128_v20, %v398_v49 }
  0xc5   : > { %791 = vmatpush.msk.msra.mxu0 %vm412_vm14, %v1030_v52  ;;  %794 = vmatpush.msk.msra.mxu1 %vm413_vm15, %v1030_v52  ;;  %v789_v54 = vsel %vm412_vm14, 1.0, %v1031_v53  ;;  %v790_v55 = vsel %vm413_vm15, 1.0, %v1031_v53  ;;  %vm411_vm3 = vcmp.eq.s32.totalorder %v1128_v20, %v409_v50  ;;  %v787_v57 = vsel %vm410_vm2, 1.0, %v1031_v53 }
  0xc6   : > { %797 = vmatpush.xpose.msk.msra.mxu2 %vm1131_vm0, %v789_v54  ;;  %799 = vmatpush.xpose.msk.msra.mxu3 %vm1131_vm0, %v790_v55  ;;  %v507_v56 = vsel %vm506_vm13, %v398_v49, %v505_v51  ;;  %v788_v58 = vsel %vm411_vm3, 1.0, %v1031_v53 }
  0xc7   : > { %792 = vmatpush.msk.msra.mxu0 %vm410_vm2, %v1030_v52  ;;  %795 = vmatpush.msk.msra.mxu1 %vm411_vm3, %v1030_v52  ;;  %512 = vst.msk [vmem:[%s230_s24] sm:$0x3] %vm510_vm1, %v507_v56 }
  0xca   : > { %798 = vmatpush.xpose.msk.msra.mxu2 %vm1131_vm0, %v787_v57  ;;  %800 = vmatpush.xpose.msk.msra.mxu3 %vm1131_vm0, %v788_v58 }
  0xcd   : > { %554 = vmatmul.f32.vlgmr.msra.gmra.mxu2 %v1030_v52  ;;  %574 = vmatmul.f32.vlgmr.msra.gmra.mxu3 %v1030_v52 }
  0xe2   : > { %v438_v59 = vpop.trf.xlu2 }
  0xe3   : > { %793 = vmatmul.msk.f32.vlgmr.msra.gmra.mxu0 %vm454_vm4, %v438_v59  ;;  %796 = vmatmul.msk.f32.vlgmr.msra.gmra.mxu1 %vm454_vm4, %v438_v59 }
  0xe4   : > { %913 = shalt.err (!%p910_p6)
}
  0xe5   : > { %811 = dma.vmem_to_hbm [thread:$0]  (%p1099_p4), %s625_s8, 32, %s627_s9, %s589_s10   ;;  %vm579_vm0 = vcmask 122880   ;;  %vm581_vm5 = vcmask 131200  }
  0xe6   : > { %s636_s5 = scalar_lea.hbm %s1243_s4, %s1016_s18  ;;  %s638_s6 = sshll.u32 %s1156_s26, 4  ;;  %s639_s6 = int_to_ptr.vmem [resolvable:$true] %s638_s6 }
  0xe7   : > { %s640_s0 = sshll.u32 %s636_s5, 4  ;;  %s934_s9 = scalar_lea.hbm %s1243_s4, 2  ;;  %s641_s0 = int_to_ptr.hbm [resolvable:$true] %s640_s0 }
  0xe8   : > { %s928_s1 = sshra.s32 %s641_s0, 4  ;;  %s929_s1 = int_to_ptr.hbm [resolvable:$true] %s928_s1 }
  0xe9   : > { %s930_s22 = scalar_lea.hbm %s929_s1, 1  ;;  %p935_p11 = scmp.lt.s32.totalorder %s929_s1, %s1243_s4 }
  0xea   : > { %p931_p7 = scmp.ne.s32.totalorder %s929_s1, %s930_s22  ;;  %p936_p12 = scmp.lt.s32.totalorder %s934_s9, %s930_s22 }
  0xec   : > { %p932_p9 = pnand %p931_p7, %p1099_p4  ;;  %p937_p13 = por %p936_p12, %p935_p11 }
  0xee   : > { %p933_p10 = pneg %p932_p9 }
  0xf0   : > { %p938_p0 = pnand %p937_p13, %p933_p10 }
 0x12c   : > { %v528_v63 = vpop.xlane.xlu1 %527 }
 0x150   : > { %v555_v60 = vpop.f32.mrf.mxu2  ;;  %v575_v61 = vpop.f32.mrf.mxu3 }
 0x151   : > { %v576_v62 = vadd.f32 %v575_v61, %v555_v60 }
 0x153   : > { %580 = vst.msk [vmem:[%s1156_s26] sm:$0x1] %vm579_vm0, %v576_v62 }
 0x154   : > { %582 = vst.msk [vmem:[%s1156_s26] sm:$0x1] %vm581_vm5, %v528_v63 }
 0x155   : > { %941 = shalt.err (!%p938_p0)
}
 0x156   : > { %812 = dma.vmem_to_hbm [thread:$0]  (%p1099_p4), %s639_s6, 16, %s641_s0, %s589_s10   ;;  %vm501_vm6 = vcmask 1043456  }
 0x157   : > { %s783_s26 = sshll.u32 %s1142_s13, 3  ;;  %s809_s21 = sshll.u32 %s1016_s18, 3 }
 0x158   : > { %s606_s30 = scalar_lea.hbm %s1241_s2, %s809_s21  ;;  %s223_s5 = scalar_lea.vmem [#allocation2], %s783_s26 }
 0x159   : > { %s608_s1 = sshll.u32 %s223_s5, 4  ;;  %s610_s22 = sshll.u32 %s606_s30, 4  ;;  %s609_s1 = int_to_ptr.vmem [resolvable:$true] %s608_s1  ;;  %s611_s22 = int_to_ptr.hbm [resolvable:$true] %s610_s22 }
 0x15a   : > { %s584_s29 = scalar_lea.sflag [#allocation3], %s1142_s13  ;;  %s956_s10 = sshra.s32 %s611_s22, 4  ;;  %s957_s10 = int_to_ptr.hbm [resolvable:$true] %s956_s10 }
 0x15b   : > { %s958_s18 = scalar_lea.hbm %s957_s10, 8  ;;  %s962_s7 = scalar_lea.hbm %s1241_s2, 16 }
 0x15c   : > { %p959_p1 = scmp.ne.s32.totalorder %s957_s10, %s958_s18  ;;  %p963_p5 = scmp.lt.s32.totalorder %s957_s10, %s1241_s2 }
 0x15d   : > { %p964_p6 = scmp.lt.s32.totalorder %s962_s7, %s958_s18 }
 0x15e   : > { %p960_p2 = pnand %p959_p1, %p1099_p4 }
 0x15f   : > { %p965_p7 = por %p964_p6, %p963_p5 }
 0x160   : > { %v495_v0 = vpop.f32.mrf.mxu1  ;;  %v475_v2 = vpop.f32.mrf.mxu0  ;;  %p961_p3 = pneg %p960_p2 }
 0x161   : > { %v500_v1 = vrot.slane %v495_v0, 4 }
 0x162   : > { %p966_p9 = pnand %p965_p7, %p961_p3 }
 0x163   : > { %v502_v3 = vsel %vm501_vm6, %v475_v2, %v500_v1 }
 0x164   : > { %504 = vst [vmem:[%s223_s5] sm:$0xff] %v502_v3 }
 0x165   : > { %969 = shalt.err (!%p966_p9)
}
 0x166   : > { %810 = dma.vmem_to_hbm [thread:$0]  (%p1099_p4), %s609_s1, 128, %s611_s22, %s584_s29  }
 0x167 PF: > { %p826_p10 = scmp.ge.s32.totalorder %s1024_s20, 2  ;;  %s652_s13 = sand.u32 1, %s1004_s15  }
 0x168   : > { %s653_s11 = scalar_lea.sflag [#allocation3], %s652_s13 }
 0x169   : > { %p817_p11 = pnand %p826_p10, %p1108_p8 }
 0x16b   : > { %p818_p12 = pneg %p817_p11 }
 0x16d   : > { %995 = dma.done.wait (%p818_p12), %s653_s11, 128  }
 0x16e   : > { %997 = vsyncadd (%p818_p12), %s653_s11, 4294967168  ;;  %s1253_s12 = sadd.s32 4294967294, %s1024_s20  }
 0x16f   : > { %s662_s26 = sand.u32 1, %s1253_s12  }
 0x170   : > { %s663_s21 = scalar_lea.sflag [#allocation5], %s662_s26 }
 0x171   : > { %999 = dma.done.wait (%p818_p12), %s663_s21, 48  }
 0x172   : > { %1001 = vsyncadd (%p818_p12), %s663_s21, 4294967248  ;;  %s21_s20 = sadd.s32 1, %s1024_s20   ;;  %s1254_s15 = smov %s1008_s16 }
 0x173   : > { %p18_p4 = scmp.ge.s32.totalorder %s21_s20, 4   ;;  %s1255_s16 = smov %s1012_s17 }
 0x174   : > { %s1256_s17 = smov %s1114_s28  ;;  %s1257_s18 = smov %s1020_s19 }
 0x175   : > { %s1258_s19 = smov %s1260_s23  ;;  %20 = sbr.rel (!%p18_p4) target bundleno = 9 (0x9), region = 95 }
 0x17a   :  { %678 = vsyncpa [#allocation3], 1 }
 0x17b   :  { %680 = vsyncpa [#allocation3 + $0x1], 1 }
 0x17c   :  { %681 = vsyncpa [#allocation5], 1 }
 0x17d   :  { %683 = vsyncpa [#allocation5 + $0x1], 1 }

</bundles_post_ra>
